<compile_context>
chip_gen: v7x
topology: tpu7x:2x2x1
jax: 0.10.0
libtpu: 0.0.40
codegen_flags: <defaults>
</compile_context>

<pallas_src>
import jax
import jax.numpy as jnp
import numpy as np
from jax.experimental import pallas as pl
from jax.experimental.pallas import tpu as pltpu

BN_EPS = 1e-5


def _round_up(x, m):
    return ((x + m - 1) // m) * m


def classifier_kernel(x_ref, wc_ref, bc_ref, wl_ref, bl_ref, out_ref):
    # Conv2d(nc, nc, 3, VALID) on a 3x3 map + folded BatchNorm == one MXU matmul.
    conv = jnp.dot(x_ref[...], wc_ref[...], preferred_element_type=jnp.float32)
    act = jnp.maximum(conv + bc_ref[...], 0.0)           # bias + ReLU in f32 (VPU)
    # Linear(nc, nz), lane-padded to 128 output columns (lane-dense store).
    out_ref[...] = (
        jnp.dot(act.astype(wl_ref.dtype), wl_ref[...],
                preferred_element_type=jnp.float32)
        + bl_ref[...]
    )


def prepare_classifier_params(params, compute_dtype=jnp.bfloat16):
    """One-time preprocessing: BN fold, transpose, lane-pad, dtype cast."""
    nz, nc = params["wl"].shape
    k = params["wc"].shape[-1]
    kin = nc * k * k

    # Fold BatchNorm (inference) into the conv weight / bias, in f32.
    scale = params["gamma"] * jax.lax.rsqrt(params["var"] + BN_EPS)        # (nc,)
    wc_t = params["wc"].reshape(nc, kin).T                                 # (kin, nc)
    wc_folded = (wc_t * scale[None, :]).astype(compute_dtype)
    bc_folded = ((params["bc"] - params["mean"]) * scale
                 + params["beta"]).reshape(1, nc).astype(jnp.float32)

    # Lane-pad the Linear weight/bias to a multiple of 128 output columns.
    npad = _round_up(max(nz, 128), 128)
    wl_pad = jnp.zeros((nc, npad), compute_dtype)
    wl_pad = wl_pad.at[:, :nz].set(params["wl"].T.astype(compute_dtype))
    bl_pad = jnp.zeros((1, npad), jnp.float32)
    bl_pad = bl_pad.at[:, :nz].set(params["bl"].astype(jnp.float32))

    return {"wc": wc_folded, "bc": bc_folded, "wl": wl_pad, "bl": bl_pad}


def _vmem_limit_bytes(tb, kin, nc, npad, cbytes):
    """Right-sized VMEM budget: (8,128)-padded tiles x double-buffer + headroom."""
    def tile(r, c, b):
        return _round_up(r, 8) * _round_up(c, 128) * b
    total = 2 * (tile(tb, kin, cbytes)      # activations
                 + tile(kin, nc, cbytes)    # folded conv weight
                 + tile(1, nc, 4)           # folded conv bias
                 + tile(nc, npad, cbytes)   # padded linear weight
                 + tile(1, npad, 4)         # padded linear bias
                 + tile(tb, npad, 4))       # output
    return int(min(96 * 1024 * 1024, max(8 * 1024 * 1024, total + 2 * 1024 * 1024)))


def make_classifier(params, compute_dtype=jnp.bfloat16, batch_tile=128):
    """Returns a jitted `feature -> logits` callable with weights prepped once."""
    prep = prepare_classifier_params(params, compute_dtype)
    nz = int(params["wl"].shape[0])
    nc = int(params["wl"].shape[1])
    k = int(params["wc"].shape[-1])
    kin = nc * k * k
    npad = int(prep["wl"].shape[1])
    cbytes = jnp.dtype(compute_dtype).itemsize

    @jax.jit
    def forward(feature, wc, bc, wl, bl):
        B = feature.shape[0]
        assert feature.shape[1:] == (nc, k, k), feature.shape

        # Batch tiling: sublane-aligned tile, batch padded up to a multiple.
        tb = min(_round_up(batch_tile, 8), _round_up(B, 8))
        bp = _round_up(B, tb)

        x = feature.reshape(B, kin).astype(compute_dtype)
        if bp != B:
            x = jnp.pad(x, ((0, bp - B), (0, 0)))

        n_tiles = bp // tb
        flops = 2 * bp * kin * nc + 2 * bp * nc * npad
        bytes_accessed = (bp * kin * cbytes                # activations in
                          + kin * nc * cbytes              # conv weight
                          + nc * 4 + npad * 4              # biases
                          + nc * npad * cbytes             # linear weight
                          + bp * npad * 4)                 # output

        out = pl.pallas_call(
            classifier_kernel,
            out_shape=jax.ShapeDtypeStruct((bp, npad), jnp.float32),
            grid_spec=pltpu.PrefetchScalarGridSpec(
                num_scalar_prefetch=0,
                grid=(n_tiles,),
                in_specs=[
                    pl.BlockSpec((tb, kin), lambda i: (i, 0)),    # activations
                    pl.BlockSpec((kin, nc), lambda i: (0, 0)),    # resident conv weight
                    pl.BlockSpec((1, nc), lambda i: (0, 0)),      # conv bias (folded BN)
                    pl.BlockSpec((nc, npad), lambda i: (0, 0)),   # resident linear weight
                    pl.BlockSpec((1, npad), lambda i: (0, 0)),    # linear bias (padded)
                ],
                out_specs=pl.BlockSpec((tb, npad), lambda i: (i, 0)),
            ),
            compiler_params=pltpu.CompilerParams(
                dimension_semantics=("parallel",),
                vmem_limit_bytes=_vmem_limit_bytes(tb, kin, nc, npad, cbytes),
            ),
            cost_estimate=pl.CostEstimate(
                flops=flops, transcendentals=0, bytes_accessed=bytes_accessed),
        )(x, wc, bc, wl, bl)
        return out[:B, :nz]

    return lambda feature: forward(feature, prep["wc"], prep["bc"],
                                   prep["wl"], prep["bl"])


def reference_forward(feature, params):
    """Pure-JAX f32 reference using a real NCHW conv (matches PyTorch semantics)."""
    conv = jax.lax.conv_general_dilated(
        feature, params["wc"], window_strides=(1, 1), padding="VALID",
        dimension_numbers=("NCHW", "OIHW", "NCHW"))
    conv = conv + params["bc"][None, :, None, None]
    inv_std = jax.lax.rsqrt(params["var"] + BN_EPS)
    bn = ((conv - params["mean"][None, :, None, None])
          * (inv_std * params["gamma"])[None, :, None, None]
          + params["beta"][None, :, None, None])
    act = jnp.maximum(bn, 0.0)
    pooled = act.reshape(feature.shape[0], -1)                  # (B, nc)
    return pooled @ params["wl"].T + params["bl"]


def init_params(key, nc, nz, ksize=3):
    ks = jax.random.split(key, 7)
    return {
        "wc": 0.05 * jax.random.normal(ks[0], (nc, nc, ksize, ksize), jnp.float32),
        "bc": 0.05 * jax.random.normal(ks[1], (nc,), jnp.float32),
        "gamma": 1.0 + 0.1 * jax.random.normal(ks[2], (nc,), jnp.float32),
        "beta": 0.1 * jax.random.normal(ks[3], (nc,), jnp.float32),
        "mean": 0.1 * jax.random.normal(ks[4], (nc,), jnp.float32),
        "var": 1.0 + 0.1 * jax.random.uniform(ks[5], (nc,), jnp.float32),
        "wl": 0.05 * jax.random.normal(ks[6], (nz, nc), jnp.float32),
        "bl": jnp.linspace(-0.1, 0.1, nz, dtype=jnp.float32),
    }


if __name__ == "__main__":
    # Small but module-consistent: 3x3 spatial is required by Conv(k=3, pad=0)
    # feeding Linear(nc, nz).
    B, nc, nz, spatial = 8, 128, 7, 3
    key = jax.random.PRNGKey(0)
    kx, kp = jax.random.split(key)
    feature = jax.random.normal(kx, (B, nc, spatial, spatial), jnp.float32)
    params = init_params(kp, nc, nz, spatial)

    classifier = make_classifier(params)           # weights folded/padded once
    out = jax.block_until_ready(classifier(feature))

    ref = jax.block_until_ready(reference_forward(feature, params))
    assert out.shape == (B, nz)
    # Tolerance loosened vs f32 reference because MXU operands are bf16
    # (accumulation stays f32 via preferred_element_type).
    np.testing.assert_allclose(np.asarray(out), np.asarray(ref), rtol=3e-2, atol=3e-2)
    print("KERNEL_OK")
</pallas_src>

<mosaic_0001>
module attributes {stable_mosaic.version = 11 : i64} {
  func.func @classifier_kernel(%arg0: i32, %arg1: memref<8x1152xbf16, #tpu.memory_space<vmem>>, %arg2: memref<1152x128xbf16, #tpu.memory_space<vmem>>, %arg3: memref<1x128xf32, #tpu.memory_space<vmem>>, %arg4: memref<128x128xbf16, #tpu.memory_space<vmem>>, %arg5: memref<1x128xf32, #tpu.memory_space<vmem>>, %arg6: memref<8x128xf32, #tpu.memory_space<vmem>>) attributes {dimension_semantics = [#tpu.dimension_semantics<parallel>], iteration_bounds = array<i64: 1>, scalar_prefetch = 0 : i64, scratch_operands = 0 : i64, tpu.core_type = #tpu.core_type<tc>, window_params = [{transform_indices = @transform_0, window_bounds = array<i64: 8, 1152>}, {pipeline_mode = #tpu.pipeline_mode<synchronous>, transform_indices = @transform_1, window_bounds = array<i64: 1152, 128>}, {pipeline_mode = #tpu.pipeline_mode<synchronous>, transform_indices = @transform_2, window_bounds = array<i64: 1, 128>}, {pipeline_mode = #tpu.pipeline_mode<synchronous>, transform_indices = @transform_3, window_bounds = array<i64: 128, 128>}, {pipeline_mode = #tpu.pipeline_mode<synchronous>, transform_indices = @transform_4, window_bounds = array<i64: 1, 128>}, {transform_indices = @transform_5, window_bounds = array<i64: 8, 128>}]} {
    %c0 = arith.constant 0 : index
    %c0_0 = arith.constant 0 : index
    %0 = vector.load %arg1[%c0, %c0_0] : memref<8x1152xbf16, #tpu.memory_space<vmem>>, vector<8x1152xbf16>
    %c0_1 = arith.constant 0 : index
    %c0_2 = arith.constant 0 : index
    %1 = vector.load %arg2[%c0_1, %c0_2] : memref<1152x128xbf16, #tpu.memory_space<vmem>>, vector<1152x128xbf16>
    %cst = arith.constant dense<0.000000e+00> : vector<8x128xf32>
    %2 = tpu.matmul %0, %1, %cst {dimension_numbers = #tpu.dot_dimension_numbers<[1], [0], [0], [1], [0, 0, 1, 1], [], []>} : vector<8x1152xbf16>, vector<1152x128xbf16>, vector<8x128xf32> -> vector<8x128xf32>
    %c0_3 = arith.constant 0 : index
    %c0_4 = arith.constant 0 : index
    %3 = vector.load %arg3[%c0_3, %c0_4] : memref<1x128xf32, #tpu.memory_space<vmem>>, vector<1x128xf32>
    %4 = vector.broadcast %3 : vector<1x128xf32> to vector<8x128xf32>
    %5 = arith.addf %2, %4 : vector<8x128xf32>
    %cst_5 = arith.constant 0.000000e+00 : f32
    %6 = vector.broadcast %cst_5 : f32 to vector<8x128xf32>
    %7 = arith.maximumf %5, %6 : vector<8x128xf32>
    %8 = arith.truncf %7 : vector<8x128xf32> to vector<8x128xbf16>
    %c0_6 = arith.constant 0 : index
    %c0_7 = arith.constant 0 : index
    %9 = vector.load %arg4[%c0_6, %c0_7] : memref<128x128xbf16, #tpu.memory_space<vmem>>, vector<128x128xbf16>
    %cst_8 = arith.constant dense<0.000000e+00> : vector<8x128xf32>
    %10 = tpu.matmul %8, %9, %cst_8 {dimension_numbers = #tpu.dot_dimension_numbers<[1], [0], [0], [1], [0, 0, 1, 1], [], []>} : vector<8x128xbf16>, vector<128x128xbf16>, vector<8x128xf32> -> vector<8x128xf32>
    %c0_9 = arith.constant 0 : index
    %c0_10 = arith.constant 0 : index
    %11 = vector.load %arg5[%c0_9, %c0_10] : memref<1x128xf32, #tpu.memory_space<vmem>>, vector<1x128xf32>
    %12 = vector.broadcast %11 : vector<1x128xf32> to vector<8x128xf32>
    %13 = arith.addf %10, %12 : vector<8x128xf32>
    %c0_11 = arith.constant 0 : index
    %c0_12 = arith.constant 0 : index
    %14 = vector.load %arg6[%c0_11, %c0_12] : memref<8x128xf32, #tpu.memory_space<vmem>>, vector<8x128xf32>
    tpu.vector_store %arg6[%c0_11, %c0_12], %13 {strides = array<i32>} : memref<8x128xf32, #tpu.memory_space<vmem>>, vector<8x128xf32>,
    return
  }
  func.func @transform_0(%arg0: i32) -> (i32, i32) {
    %c0_i32 = arith.constant 0 : i32
    %c0_i32_0 = arith.constant 0 : i32
    return %arg0, %c0_i32 : i32, i32
  }
  func.func @transform_1(%arg0: i32) -> (i32, i32) {
    %c0_i32 = arith.constant 0 : i32
    %c0_i32_0 = arith.constant 0 : i32
    %c0_i32_1 = arith.constant 0 : i32
    return %c0_i32, %c0_i32_0 : i32, i32
  }
  func.func @transform_2(%arg0: i32) -> (i32, i32) {
    %c0_i32 = arith.constant 0 : i32
    %c0_i32_0 = arith.constant 0 : i32
    %c0_i32_1 = arith.constant 0 : i32
    return %c0_i32, %c0_i32_0 : i32, i32
  }
  func.func @transform_3(%arg0: i32) -> (i32, i32) {
    %c0_i32 = arith.constant 0 : i32
    %c0_i32_0 = arith.constant 0 : i32
    %c0_i32_1 = arith.constant 0 : i32
    return %c0_i32, %c0_i32_0 : i32, i32
  }
  func.func @transform_4(%arg0: i32) -> (i32, i32) {
    %c0_i32 = arith.constant 0 : i32
    %c0_i32_0 = arith.constant 0 : i32
    %c0_i32_1 = arith.constant 0 : i32
    return %c0_i32, %c0_i32_0 : i32, i32
  }
  func.func @transform_5(%arg0: i32) -> (i32, i32) {
    %c0_i32 = arith.constant 0 : i32
    %c0_i32_0 = arith.constant 0 : i32
    return %arg0, %c0_i32 : i32, i32
  }
}

</mosaic_0001>

<bundles_post_ra>
// kernel: forward.1
= control target key start
LH: loop header
LB: loop body
LE: loop exit
PB: predicated region body
PF: predicated region fallthrough
CT: control target
= control target key end

     0   :  { %vm1324_vm0 = vmmov 0   ;;  %s1629_s0 = inlined_call_operand.vmem [shape: bf16[8,1152], index: 0, kind: input, shape index: {}]   ;;  %s1630_s1 = inlined_call_operand.vmem [shape: bf16[1152,128], index: 1, kind: input, shape index: {}]   ;;  %s1631_s2 = inlined_call_operand.vmem [shape: f32[1,128], index: 2, kind: input, shape index: {}]   ;;  %s1632_s3 = inlined_call_operand.vmem [shape: bf16[128,128], index: 3, kind: input, shape index: {}]   ;;  %s1633_s4 = inlined_call_operand.vmem [shape: f32[1,128], index: 4, kind: input, shape index: {}]   ;;  %s1634_s5 = inlined_call_operand.hbm [shape: f32[8,128], index: 5, kind: output, shape index: {}]  }
   0x1   :  { %v1210_v0 = vld [vmem:[%s1630_s1 + $0x40] sm:$0xff]   ;;  %v1214_v4 = vld [vmem:[%s1630_s1 + $0x48] sm:$0xff]   ;;  %v1218_v8 = vld [vmem:[%s1630_s1 + $0x50] sm:$0xff]  }
   0x2   :  { %v1211_v1 = vld [vmem:[%s1630_s1] sm:$0xff]   ;;  %1061 = vmatprep.subr.bf16.mxu0 %v1210_v0  ;;  %v1215_v5 = vld [vmem:[%s1630_s1 + $0x8] sm:$0xff]   ;;  %v1219_v9 = vld [vmem:[%s1630_s1 + $0x10] sm:$0xff]  }
   0x3   :  { %v1212_v2 = vld [vmem:[%s1630_s1 + $0xc0] sm:$0xff]   ;;  %1062 = vmatpush3.bf16.msra.mxu0 %v1211_v1  ;;  %v1216_v6 = vld [vmem:[%s1630_s1 + $0xc8] sm:$0xff]   ;;  %v1220_v10 = vld [vmem:[%s1630_s1 + $0xd0] sm:$0xff]  }
   0x4   :  { %v1213_v3 = vld [vmem:[%s1630_s1 + $0x80] sm:$0xff]   ;;  %1083 = vmatprep.subr.bf16.mxu1 %v1212_v2  ;;  %1063 = vmatprep.subr.bf16.mxu0 %v1214_v4  ;;  %v1217_v7 = vld [vmem:[%s1630_s1 + $0x88] sm:$0xff]   ;;  %v1221_v11 = vld [vmem:[%s1630_s1 + $0x90] sm:$0xff]  }
   0x5   :  { %1084 = vmatpush3.bf16.msra.mxu1 %v1213_v3  ;;  %v1222_v12 = vld [vmem:[%s1630_s1 + $0x58] sm:$0xff]   ;;  %v1226_v16 = vld [vmem:[%s1630_s1 + $0x60] sm:$0xff]   ;;  %v1230_v20 = vld [vmem:[%s1630_s1 + $0x68] sm:$0xff]  }
   0x6   :  { %1085 = vmatprep.subr.bf16.mxu1 %v1216_v6  ;;  %v1223_v13 = vld [vmem:[%s1630_s1 + $0x18] sm:$0xff]   ;;  %v1227_v17 = vld [vmem:[%s1630_s1 + $0x20] sm:$0xff]   ;;  %v1231_v21 = vld [vmem:[%s1630_s1 + $0x28] sm:$0xff]  }
   0x7   :  { %1064 = vmatpush3.bf16.msra.mxu0 %v1215_v5  ;;  %v1224_v14 = vld [vmem:[%s1630_s1 + $0xd8] sm:$0xff]   ;;  %v1228_v18 = vld [vmem:[%s1630_s1 + $0xe0] sm:$0xff]   ;;  %v1232_v22 = vld [vmem:[%s1630_s1 + $0xe8] sm:$0xff]  }
   0x8   :  { %1065 = vmatprep.subr.bf16.mxu0 %v1218_v8  ;;  %v1225_v15 = vld [vmem:[%s1630_s1 + $0x98] sm:$0xff]   ;;  %v1229_v19 = vld [vmem:[%s1630_s1 + $0xa0] sm:$0xff]   ;;  %v1233_v23 = vld [vmem:[%s1630_s1 + $0xa8] sm:$0xff]  }
   0x9   :  { %1086 = vmatpush3.bf16.msra.mxu1 %v1217_v7  ;;  %v1234_v24 = vld [vmem:[%s1630_s1 + $0x70] sm:$0xff]   ;;  %v1238_v28 = vld [vmem:[%s1630_s1 + $0x78] sm:$0xff]   ;;  %v22_v31 = vld [vmem:[%s1629_s0] sm:$0xff] }
   0xa   :  { %1087 = vmatprep.subr.bf16.mxu1 %v1220_v10  ;;  %v1235_v25 = vld [vmem:[%s1630_s1 + $0x30] sm:$0xff]   ;;  %v1239_v29 = vld [vmem:[%s1630_s1 + $0x38] sm:$0xff]   ;;  %v971_v32 = vcombine.low %v22_v31, %v22_v31  ;;  %v972_v33 = vcombine.high %v22_v31, %v22_v31  ;;  %v1244_v35 = vld [vmem:[%s1630_s1 + $0x140] sm:$0xff]  }
   0xb   :  { %1066 = vmatpush3.bf16.msra.mxu0 %v1219_v9  ;;  %v1236_v26 = vld [vmem:[%s1630_s1 + $0xf0] sm:$0xff]   ;;  %v1240_v30 = vld [vmem:[%s1630_s1 + $0xf8] sm:$0xff]   ;;  %v23_v36 = vld [vmem:[%s1629_s0 + $0x8] sm:$0xff]  ;;  %v1323_v9 = vmov 0.0  }
   0xc   :  { %1067 = vmatprep.subr.bf16.mxu0 %v1222_v12  ;;  %v1237_v27 = vld [vmem:[%s1630_s1 + $0xb0] sm:$0xff]   ;;  %v1243_v34 = vld [vmem:[%s1630_s1 + $0xb8] sm:$0xff]   ;;  %674 = vmatprep.mubr.bf16.mxu0 %v972_v33  ;;  %v973_v37 = vcombine.low %v23_v36, %v23_v36  ;;  %v974_v38 = vcombine.high %v23_v36, %v23_v36  ;;  %v1247_v39 = vld [vmem:[%s1630_s1 + $0x100] sm:$0xff]  }
   0xd   :  { %1088 = vmatpush3.bf16.msra.mxu1 %v1221_v11  ;;  %v1248_v40 = vld [vmem:[%s1630_s1 + $0x1c0] sm:$0xff]   ;;  %v1250_v42 = vld [vmem:[%s1630_s1 + $0x148] sm:$0xff]   ;;  %v1254_v46 = vld [vmem:[%s1630_s1 + $0x150] sm:$0xff]  }
   0xe   :  { %1089 = vmatprep.subr.bf16.mxu1 %v1224_v14  ;;  %714 = vmatprep.mubr.bf16.mxu1 %v974_v38  ;;  %v1249_v41 = vld [vmem:[%s1630_s1 + $0x180] sm:$0xff]   ;;  %v1251_v43 = vld [vmem:[%s1630_s1 + $0x108] sm:$0xff]   ;;  %v1255_v47 = vld [vmem:[%s1630_s1 + $0x110] sm:$0xff]  }
   0xf   :  { %1068 = vmatpush3.bf16.msra.mxu0 %v1223_v13  ;;  %v1252_v44 = vld [vmem:[%s1630_s1 + $0x1c8] sm:$0xff]   ;;  %v1256_v48 = vld [vmem:[%s1630_s1 + $0x1d0] sm:$0xff]   ;;  %v1258_v50 = vld [vmem:[%s1630_s1 + $0x158] sm:$0xff]  }
  0x10   :  { %1069 = vmatprep.subr.bf16.mxu0 %v1226_v16  ;;  %v1253_v45 = vld [vmem:[%s1630_s1 + $0x188] sm:$0xff]   ;;  %v1257_v49 = vld [vmem:[%s1630_s1 + $0x190] sm:$0xff]   ;;  %v1259_v51 = vld [vmem:[%s1630_s1 + $0x118] sm:$0xff]  }
  0x11   :  { %1090 = vmatpush3.bf16.msra.mxu1 %v1225_v15  ;;  %v1260_v52 = vld [vmem:[%s1630_s1 + $0x1d8] sm:$0xff]   ;;  %v1262_v54 = vld [vmem:[%s1630_s1 + $0x160] sm:$0xff]   ;;  %v1266_v58 = vld [vmem:[%s1630_s1 + $0x168] sm:$0xff]  }
  0x12   :  { %1091 = vmatprep.subr.bf16.mxu1 %v1228_v18  ;;  %v1261_v53 = vld [vmem:[%s1630_s1 + $0x198] sm:$0xff]   ;;  %v1263_v55 = vld [vmem:[%s1630_s1 + $0x120] sm:$0xff]   ;;  %v1267_v59 = vld [vmem:[%s1630_s1 + $0x128] sm:$0xff]  }
  0x13   :  { %1070 = vmatpush3.bf16.msra.mxu0 %v1227_v17  ;;  %v1264_v56 = vld [vmem:[%s1630_s1 + $0x1e0] sm:$0xff]   ;;  %v1268_v60 = vld [vmem:[%s1630_s1 + $0x1e8] sm:$0xff]   ;;  %v1270_v62 = vld [vmem:[%s1630_s1 + $0x170] sm:$0xff]  }
  0x14   :  { %1071 = vmatprep.subr.bf16.mxu0 %v1230_v20  ;;  %v1265_v57 = vld [vmem:[%s1630_s1 + $0x1a0] sm:$0xff]   ;;  %v1269_v61 = vld [vmem:[%s1630_s1 + $0x1a8] sm:$0xff]   ;;  %v1271_v63 = vld [vmem:[%s1630_s1 + $0x130] sm:$0xff]  }
  0x15   :  { %1092 = vmatpush3.bf16.msra.mxu1 %v1229_v19  ;;  %v1272_v0 = vld [vmem:[%s1630_s1 + $0x1f0] sm:$0xff]   ;;  %v1274_v2 = vld [vmem:[%s1630_s1 + $0x178] sm:$0xff]   ;;  %v1282_v13 = vld [vmem:[%s1630_s1 + $0x200] sm:$0xff]  }
  0x16   :  { %1093 = vmatprep.subr.bf16.mxu1 %v1232_v22  ;;  %v1273_v1 = vld [vmem:[%s1630_s1 + $0x1b0] sm:$0xff]   ;;  %v1275_v3 = vld [vmem:[%s1630_s1 + $0x138] sm:$0xff]   ;;  %v1283_v14 = vld [vmem:[%s1630_s1 + $0x208] sm:$0xff]  }
  0x17   :  { %1072 = vmatpush3.bf16.msra.mxu0 %v1231_v21  ;;  %v1276_v4 = vld [vmem:[%s1630_s1 + $0x1f8] sm:$0xff]   ;;  %v24_v5 = vld [vmem:[%s1629_s0 + $0x10] sm:$0xff] }
  0x18   :  { %1073 = vmatprep.subr.bf16.mxu0 %v1234_v24  ;;  %v975_v6 = vcombine.low %v24_v5, %v24_v5  ;;  %v976_v7 = vcombine.high %v24_v5, %v24_v5  ;;  %v1279_v8 = vld [vmem:[%s1630_s1 + $0x1b8] sm:$0xff]   ;;  %v1284_v15 = vld [vmem:[%s1630_s1 + $0x210] sm:$0xff]  }
  0x19   :  { %1094 = vmatpush3.bf16.msra.mxu1 %v1233_v23  ;;  %v25_v10 = vld [vmem:[%s1629_s0 + $0x18] sm:$0xff] }
  0x1a   :  { %1095 = vmatprep.subr.bf16.mxu1 %v1236_v26  ;;  %v977_v11 = vcombine.low %v25_v10, %v25_v10  ;;  %v978_v12 = vcombine.high %v25_v10, %v25_v10  ;;  %v1285_v16 = vld [vmem:[%s1630_s1 + $0x218] sm:$0xff]  }
  0x1b   :  { %1074 = vmatpush3.bf16.msra.mxu0 %v1235_v25 }
  0x1c   :  { %1075 = vmatprep.subr.bf16.mxu0 %v1238_v28 }
  0x1d   :  { %1096 = vmatpush3.bf16.msra.mxu1 %v1237_v27 }
  0x1e   :  { %1097 = vmatprep.subr.bf16.mxu1 %v1240_v30 }
  0x1f   :  { %1076 = vmatpush3.bf16.msra.mxu0 %v1239_v29 }
  0x20   :  { %1105 = vmatprep.subr.bf16.mxu0 %v1244_v35 }
  0x21   :  { %1098 = vmatpush3.bf16.msra.mxu1 %v1243_v34 }
  0x22   :  { %675 = vmatmul.mubr.bf16.vlgmr.msra.gmra.mrb[0].mxu0 %v971_v32  ;;  %1127 = vmatprep.subr.bf16.mxu1 %v1248_v40 }
  0x23   :  { %1106 = vmatpush3.bf16.msra.mxu0 %v1247_v39  ;;  %754 = vmatprep.mubr.bf16.mxu0 %v976_v7 }
  0x24   :  { %715 = vmatmul.mubr.bf16.vlgmr.msra.gmra.mrb[0].mxu1 %v973_v37  ;;  %1107 = vmatprep.subr.bf16.mxu0 %v1250_v42 }
  0x25   :  { %1128 = vmatpush3.bf16.msra.mxu1 %v1249_v41  ;;  %794 = vmatprep.mubr.bf16.mxu1 %v978_v12 }
  0x26   :  { %1129 = vmatprep.subr.bf16.mxu1 %v1252_v44 }
  0x27   :  { %1108 = vmatpush3.bf16.msra.mxu0 %v1251_v43 }
  0x28   :  { %1109 = vmatprep.subr.bf16.mxu0 %v1254_v46 }
  0x29   :  { %1130 = vmatpush3.bf16.msra.mxu1 %v1253_v45 }
  0x2a   :  { %1131 = vmatprep.subr.bf16.mxu1 %v1256_v48 }
  0x2b   :  { %1110 = vmatpush3.bf16.msra.mxu0 %v1255_v47 }
  0x2c   :  { %1111 = vmatprep.subr.bf16.mxu0 %v1258_v50 }
  0x2d   :  { %1132 = vmatpush3.bf16.msra.mxu1 %v1257_v49 }
  0x2e   :  { %1133 = vmatprep.subr.bf16.mxu1 %v1260_v52 }
  0x2f   :  { %1112 = vmatpush3.bf16.msra.mxu0 %v1259_v51 }
  0x30   :  { %1113 = vmatprep.subr.bf16.mxu0 %v1262_v54 }
  0x31   :  { %1134 = vmatpush3.bf16.msra.mxu1 %v1261_v53 }
  0x32   :  { %1135 = vmatprep.subr.bf16.mxu1 %v1264_v56 }
  0x33   :  { %1114 = vmatpush3.bf16.msra.mxu0 %v1263_v55 }
  0x34   :  { %1115 = vmatprep.subr.bf16.mxu0 %v1266_v58 }
  0x35   :  { %1136 = vmatpush3.bf16.msra.mxu1 %v1265_v57 }
  0x36   :  { %1137 = vmatprep.subr.bf16.mxu1 %v1268_v60 }
  0x37   :  { %1116 = vmatpush3.bf16.msra.mxu0 %v1267_v59 }
  0x38   :  { %1117 = vmatprep.subr.bf16.mxu0 %v1270_v62 }
  0x39   :  { %1138 = vmatpush3.bf16.msra.mxu1 %v1269_v61 }
  0x3a   :  { %1139 = vmatprep.subr.bf16.mxu1 %v1272_v0 }
  0x3b   :  { %1118 = vmatpush3.bf16.msra.mxu0 %v1271_v63 }
  0x3c   :  { %1119 = vmatprep.subr.bf16.mxu0 %v1274_v2 }
  0x3d   :  { %1140 = vmatpush3.bf16.msra.mxu1 %v1273_v1 }
  0x3e   :  { %1141 = vmatprep.subr.bf16.mxu1 %v1276_v4 }
  0x3f   :  { %1120 = vmatpush3.bf16.msra.mxu0 %v1275_v3 }
  0x40   :  { %1167 = vmatprep.subr.bf16.mxu0 %v1323_v9 }
  0x41   :  { %1142 = vmatpush3.bf16.msra.mxu1 %v1279_v8 }
  0x42   :  { %755 = vmatmul.mubr.bf16.vlgmr.msra.gmra.mrb[4].mxu0 %v975_v6  ;;  %1187 = vmatprep.subr.bf16.mxu1 %v1323_v9 }
  0x43   :  { %1168 = vmatpush3.bf16.msra.mxu0 %v1282_v13  ;;  %1183 = vmatprep.mubr.msk.bf16.mxu0 %vm1324_vm0, %v1323_v9 }
  0x44   :  { %795 = vmatmul.mubr.bf16.vlgmr.msra.gmra.mrb[4].mxu1 %v977_v11  ;;  %1169 = vmatprep.subr.bf16.mxu0 %v1323_v9 }
  0x45   :  { %1203 = vmatprep.mubr.msk.bf16.mxu1 %vm1324_vm0, %v1323_v9 }
  0x47   :  { %1170 = vmatpush3.bf16.msra.mxu0 %v1283_v14 }
  0x48   :  { %1171 = vmatprep.subr.bf16.mxu0 %v1323_v9 }
  0x4b   :  { %1172 = vmatpush3.bf16.msra.mxu0 %v1284_v15 }
  0x4c   :  { %1173 = vmatprep.subr.bf16.mxu0 %v1323_v9 }
  0x4d   :  { %10 = vsyncpa [#allocation3], 0  ;;  %v1286_v17 = vld [vmem:[%s1630_s1 + $0x220] sm:$0xff]   ;;  %v1287_v18 = vld [vmem:[%s1630_s1 + $0x228] sm:$0xff]   ;;  %s1325_s13 = smov [#allocation2]  }
  0x4e   :  { %v1288_v19 = vld [vmem:[%s1630_s1 + $0x230] sm:$0xff]   ;;  %v1289_v20 = vld [vmem:[%s1630_s1 + $0x238] sm:$0xff]   ;;  %v1290_v21 = vld [vmem:[%s1629_s0 + $0x20] ss:$0 sps:$4 sm:$0xff]   ;;  %s962_s14 = sshll.u32 %s1325_s13, 4  ;;  %s963_s14 = int_to_ptr.vmem [resolvable:$true] %s962_s14 }
  0x4f   :  { %1174 = vmatpush3.bf16.msra.mxu0 %v1285_v16  ;;  %v1291_v22 = vld [vmem:[%s1632_s3] sm:$0xff]   ;;  %v1292_v23 = vld [vmem:[%s1632_s3 + $0x8] sm:$0xff]   ;;  %v1293_v24 = vld [vmem:[%s1632_s3 + $0x10] sm:$0xff]   ;;  %s1299_s15 = scalar_lea.vmem %s963_s14, 128  ;;  %p1304_p1 = scmp.lt.s32.totalorder %s963_s14, %s963_s14 }
  0x50   :  { %1175 = vmatprep.subr.bf16.mxu0 %v1323_v9  ;;  %1188 = vmatpush3.bf16.msra.mxu1 %v1291_v22  ;;  %v1294_v25 = vld [vmem:[%s1632_s3 + $0x18] sm:$0xff]   ;;  %v1295_v26 = vld [vmem:[%s1632_s3 + $0x20] sm:$0xff]   ;;  %v1296_v27 = vld [vmem:[%s1632_s3 + $0x28] sm:$0xff]   ;;  %p1300_p0 = scmp.ne.s32.totalorder %s963_s14, %s1299_s15  ;;  %p1305_p2 = scmp.lt.s32.totalorder %s1299_s15, %s1299_s15 }
  0x51   :  { %1189 = vmatprep.subr.bf16.mxu1 %v1323_v9  ;;  %v1297_v28 = vld [vmem:[%s1632_s3 + $0x30] sm:$0xff]   ;;  %v1298_v29 = vld [vmem:[%s1632_s3 + $0x38] sm:$0xff]   ;;  %v970_v31 = vld [vmem:[%s1631_s2] ss:$0 sm:$0xff] }
  0x52   :  { %v1052_v62 = vld [vmem:[%s1633_s4] ss:$0 sm:$0xff]  ;;  %p1306_p3 = por %p1305_p2, %p1304_p1 }
  0x53   :  { %1176 = vmatpush3.bf16.msra.mxu0 %v1286_v17 }
  0x54   :  { %1177 = vmatprep.subr.bf16.mxu0 %v1323_v9  ;;  %1190 = vmatpush3.bf16.msra.mxu1 %v1292_v23  ;;  %p1307_p4 = pnand %p1306_p3, %p1300_p0 }
  0x55   :  { %1191 = vmatprep.subr.bf16.mxu1 %v1323_v9 }
  0x57   :  { %1178 = vmatpush3.bf16.msra.mxu0 %v1287_v18 }
  0x58   :  { %1179 = vmatprep.subr.bf16.mxu0 %v1323_v9  ;;  %1192 = vmatpush3.bf16.msra.mxu1 %v1293_v24 }
  0x59   :  { %1193 = vmatprep.subr.bf16.mxu1 %v1323_v9 }
  0x5b   :  { %1180 = vmatpush3.bf16.msra.mxu0 %v1288_v19 }
  0x5c   :  { %1181 = vmatprep.subr.bf16.mxu0 %v1323_v9  ;;  %1194 = vmatpush3.bf16.msra.mxu1 %v1294_v25 }
  0x5d   :  { %1195 = vmatprep.subr.bf16.mxu1 %v1323_v9 }
  0x5f   :  { %1182 = vmatpush3.bf16.msra.mxu0 %v1289_v20 }
  0x60   :  { %1196 = vmatpush3.bf16.msra.mxu1 %v1295_v26 }
  0x61   :  { %1197 = vmatprep.subr.bf16.mxu1 %v1323_v9 }
  0x62   :  { %1184 = vmatmul.mubr.bf16.vlgmr.msra.gmra.mrb[8].mxu0 %v1290_v21 }
  0x64   :  { %1198 = vmatpush3.bf16.msra.mxu1 %v1296_v27 }
  0x65   :  { %1199 = vmatprep.subr.bf16.mxu1 %v1323_v9 }
  0x68   :  { %1200 = vmatpush3.bf16.msra.mxu1 %v1297_v28 }
  0x69   :  { %1201 = vmatprep.subr.bf16.mxu1 %v1323_v9 }
  0x6c   :  { %1202 = vmatpush3.bf16.msra.mxu1 %v1298_v29 }
  0xf5   :  { %v1077_v30 = vpop.f32.mrb[0].mxu0 }
  0xf6   :  { %v1078_v32 = vpop.f32.mrb[1].mxu0 }
  0xf7   :  { %v1079_v33 = vadd.f32 %v1078_v32, %v1077_v30  ;;  %v1080_v34 = vpop.f32.mrb[2].mxu0  ;;  %v1099_v35 = vpop.f32.mrb[0].mxu1 }
  0xf8   :  { %v1081_v36 = vpop.f32.mrb[3].mxu0  ;;  %v1100_v37 = vpop.f32.mrb[1].mxu1 }
  0xf9   :  { %v677_v38 = vadd.f32 %v1079_v33, %v970_v31  ;;  %v1101_v39 = vadd.f32 %v1100_v37, %v1099_v35  ;;  %v1102_v40 = vpop.f32.mrb[2].mxu1 }
  0xfa   :  { %v1103_v41 = vpop.f32.mrb[3].mxu1 }
  0xfb   :  { %v717_v42 = vadd.f32 %v1101_v39, %v677_v38 }
 0x115   :  { %v1121_v43 = vpop.f32.mrb[4].mxu0 }
 0x116   :  { %v1122_v44 = vpop.f32.mrb[5].mxu0 }
 0x117   :  { %v1123_v45 = vadd.f32 %v1122_v44, %v1121_v43  ;;  %v1124_v46 = vpop.f32.mrb[6].mxu0  ;;  %v1143_v47 = vpop.f32.mrb[4].mxu1 }
 0x118   :  { %v1125_v48 = vpop.f32.mrb[7].mxu0  ;;  %v1144_v49 = vpop.f32.mrb[5].mxu1 }
 0x119   :  { %v757_v50 = vadd.f32 %v1123_v45, %v717_v42  ;;  %v1145_v51 = vadd.f32 %v1144_v49, %v1143_v47  ;;  %v1146_v52 = vpop.f32.mrb[6].mxu1 }
 0x11a   :  { %v1147_v53 = vpop.f32.mrb[7].mxu1 }
 0x11b   :  { %v797_v54 = vadd.f32 %v1145_v51, %v757_v50 }
 0x135   :  { %v836_v55 = vpop.f32.mrb[8].mxu0 }
 0x136   :  { %v837_v56 = vadd.f32 %v836_v55, %v797_v54  ;;  %v1185_v57 = vpop.f32.mrb[9].mxu0 }
 0x137   :  { %v839_v58 = vpop.f32.mrb[10].mxu0 }
 0x138   :  { %v842_v59 = vmax.f32 %v837_v56, 0.0  ;;  %v1186_v60 = vpop.f32.mrb[11].mxu0 }
 0x13a   :  { %v843_v61 = vpack.c.bf16 %v842_v59, %v842_v59 }
 0x13c   :  { %1204 = vmatmul.mubr.bf16.vlgmr.msra.gmra.mrb[8].mxu1 %v843_v61 }
 0x20f   :  { %v949_v63 = vpop.f32.mrb[8].mxu1 }
 0x210   :  { %v950_v0 = vadd.f32 %v1052_v62, %v949_v63  ;;  %v1205_v1 = vpop.f32.mrb[9].mxu1 }
 0x211   :  { %v952_v2 = vpop.f32.mrb[10].mxu1 }
 0x212   :  { %955 = vst [vmem:[#allocation2] sm:$0xff] %v950_v0  ;;  %v1206_v3 = vpop.f32.mrb[11].mxu1 }
 0x213   :  { %1310 = shalt.err (!%p1307_p4)
}
 0x214   :  { %s1311_s4 = scalar_lea.hbm %s1634_s5, 128 }
 0x215   :  { %p1312_p5 = scmp.ne.s32.totalorder %s1634_s5, %s1311_s4  ;;  %p1315_p6 = scmp.lt.u32.totalorder %s1311_s4, %s1634_s5 }
 0x217   :  { %p1317_p7 = pnand %p1315_p6, %p1312_p5 }
 0x219   :  { %1320 = shalt.err (!%p1317_p7)
}
 0x21a   :  { %965 = dma.vmem_to_hbm [thread:$0]  %s963_s14, 128, %s1634_s5, [#allocation3]  }
 0x21b   :  { %1321 = dma.done.wait [#allocation3], 128  }
 0x21c   :  { %1322 = vsyncadd [#allocation3], 4294967168 }
 0x21d   :  { %969 = vsyncpa [#allocation3], 1 }

</bundles_post_ra>
